<compile_context>
chip_gen: v5e
topology: v5e:2x2
jax: 0.10.0
libtpu: 0.0.40
codegen_flags: <defaults>
</compile_context>

<pallas_src>
import functools

import jax
import jax.numpy as jnp
from jax.experimental import pallas as pl
from jax.experimental.pallas import tpu as pltpu


def _round_up(x: int, m: int) -> int:
    return ((x + m - 1) // m) * m


def simplenet_kernel(x_ref, w1_ref, b1_ref, w2_ref, b2_ref, o_ref):
    # Fused: cast -> MXU matmul -> bias+ReLU (VPU) -> MXU matmul -> bias -> store.
    x = x_ref[...].astype(w1_ref.dtype)                              # f32 -> bf16 on VPU
    h = jnp.dot(x, w1_ref[...], preferred_element_type=jnp.float32)  # (tb, H) f32
    h = jnp.maximum(h + b1_ref[...], 0.0)                            # bias + ReLU in f32
    y = jnp.dot(h.astype(w2_ref.dtype), w2_ref[...],
                preferred_element_type=jnp.float32)                  # (tb, D_out_pad) f32
    d_out = o_ref.shape[-1]
    # Compact store: only the real D_out lanes go back to HBM (masked vst is
    # cheap; HBM bytes are the bottleneck, not store slots).
    o_ref[...] = (y[:, :d_out] + b2_ref[...]).astype(o_ref.dtype)


def prepare_params(w1, b1, w2, b2, *, compute_dtype=jnp.bfloat16, lane=128):
    """One-time layout prep (do NOT call per forward).

    w1: (H, D_in), b1: (H,), w2: (D_out, H), b2: (D_out,)  [PyTorch nn.Linear layout]
    Weights pre-transposed to (in, out) bf16; w2 columns zero-padded to 128 lanes
    (resident-VMEM cost only — the padded lanes never reach HBM on the output side).
    """
    H, D_in = w1.shape
    D_out = w2.shape[0]
    D_out_pad = _round_up(max(D_out, lane), lane)

    w1_t = jnp.asarray(w1).T.astype(compute_dtype)                          # (D_in, H)
    w2_t = jnp.zeros((H, D_out_pad), compute_dtype)
    w2_t = w2_t.at[:, :D_out].set(jnp.asarray(w2).T.astype(compute_dtype))  # (H, D_out_pad)
    b1_2d = jnp.asarray(b1).reshape(1, H).astype(jnp.float32)               # (1, H)
    b2_2d = jnp.asarray(b2).reshape(1, D_out).astype(jnp.float32)           # (1, D_out)
    return {"w1_t": w1_t, "b1": b1_2d, "w2_t": w2_t, "b2": b2_2d}


def simplenet_forward(x, params, *, tile_b=1024):
    """x: (B, D_in) f32 (or bf16). Returns (B, D_out) f32."""
    w1_t, b1_2d, w2_t, b2_2d = params["w1_t"], params["b1"], params["w2_t"], params["b2"]

    B, D_in = x.shape
    H = w1_t.shape[1]
    D_out = b2_2d.shape[1]
    D_out_pad = w2_t.shape[1]

    # Batch tile: multiple of 8 sublanes, capped at tile_b; prefer >=2 tiles so
    # v7x's two TensorCores both get work (no-op on v5e/v6e).
    tb = min(tile_b, _round_up(B, 8))
    if B > 8 and pl.cdiv(B, tb) < 2:
        tb = _round_up(pl.cdiv(B, 2), 8)
    grid_b = pl.cdiv(B, tb)

    itemsize = jnp.dtype(x.dtype).itemsize
    cost = pl.CostEstimate(
        flops=2 * B * (D_in * H + H * D_out_pad),
        transcendentals=0,
        bytes_accessed=(B * D_in * itemsize          # x stream
                        + B * D_out * 4              # compact f32 output stream
                        + w1_t.size * 2 + w2_t.size * 2
                        + (H + D_out) * 4),          # biases
    )

    return pl.pallas_call(
        simplenet_kernel,
        out_shape=jax.ShapeDtypeStruct((B, D_out), jnp.float32),
        grid=(grid_b,),
        in_specs=[
            pl.BlockSpec((tb, D_in), lambda i: (i, 0)),        # x tile (pipelined, ragged tail OK)
            pl.BlockSpec((D_in, H), lambda i: (0, 0)),         # w1 resident
            pl.BlockSpec((1, H), lambda i: (0, 0)),            # b1 resident
            pl.BlockSpec((H, D_out_pad), lambda i: (0, 0)),    # w2 resident (lane-padded)
            pl.BlockSpec((1, D_out), lambda i: (0, 0)),        # b2 resident (compact)
        ],
        out_specs=pl.BlockSpec((tb, D_out), lambda i: (i, 0)), # compact output store
        compiler_params=pltpu.CompilerParams(
            dimension_semantics=("parallel",),                 # shard batch tiles across TCs (v7x)
            vmem_limit_bytes=32 * 1024 * 1024,                 # ample on v5e/v6e/v7x for these tiny tiles
        ),
        cost_estimate=cost,
        # TODO(synk): for non-toy layer sizes, K-tile the contraction with a VMEM
        # accumulator + pl.when init/finalize instead of resident full weights.
    )(x, w1_t, b1_2d, w2_t, b2_2d)


def reference_forward(x, w1, b1, w2, b2):
    h = jnp.maximum(x @ w1.T + b1, 0.0)
    return h @ w2.T + b2


if __name__ == "__main__":
    input_dim, hidden_dim, output_dim = 32, 64, 16

    key = jax.random.PRNGKey(0)
    k_x, k_w1, k_b1, k_w2, k_b2 = jax.random.split(key, 5)

    # Deterministic init mimicking nn.Linear's uniform(-1/sqrt(fan_in), 1/sqrt(fan_in))
    lim1 = 1.0 / jnp.sqrt(jnp.float32(input_dim))
    lim2 = 1.0 / jnp.sqrt(jnp.float32(hidden_dim))
    w1 = jax.random.uniform(k_w1, (hidden_dim, input_dim), jnp.float32, -lim1, lim1)
    b1 = jax.random.uniform(k_b1, (hidden_dim,), jnp.float32, -lim1, lim1)
    w2 = jax.random.uniform(k_w2, (output_dim, hidden_dim), jnp.float32, -lim2, lim2)
    b2 = jax.random.uniform(k_b2, (output_dim,), jnp.float32, -lim2, lim2)

    # One-time parameter preparation (kept out of the per-call hot path).
    params = prepare_params(w1, b1, w2, b2)
    fwd = jax.jit(functools.partial(simplenet_forward, params=params))

    ok = True
    # batch=8: single-tile path (matches the toy module scale).
    # batch=250: multi-tile path with a ragged last block (exercises edge-block
    #            handling and the dual-TC split on v7x).
    for batch in (8, 250):
        x = jax.random.normal(k_x, (batch, input_dim), dtype=jnp.float32)
        out = fwd(x)
        jax.block_until_ready(out)
        ref = reference_forward(x, w1, b1, w2, b2)
        assert out.shape == (batch, output_dim)
        # bf16 matmul inputs with f32 accumulation -> loosened tolerance vs. pure f32.
        ok = ok and bool(jnp.allclose(out, ref, atol=5e-2, rtol=5e-2))

    assert ok
    print("KERNEL_OK")
</pallas_src>

<mosaic_0001>
module attributes {stable_mosaic.version = 11 : i64} {
  func.func @simplenet_kernel(%arg0: i32, %arg1: memref<8x32xf32, #tpu.memory_space<vmem>>, %arg2: memref<32x64xbf16, #tpu.memory_space<vmem>>, %arg3: memref<1x64xf32, #tpu.memory_space<vmem>>, %arg4: memref<64x128xbf16, #tpu.memory_space<vmem>>, %arg5: memref<1x16xf32, #tpu.memory_space<vmem>>, %arg6: memref<8x16xf32, #tpu.memory_space<vmem>>) attributes {dimension_semantics = [#tpu.dimension_semantics<parallel>], iteration_bounds = array<i64: 1>, scalar_prefetch = 0 : i64, scratch_operands = 0 : i64, tpu.core_type = #tpu.core_type<tc>, window_params = [{transform_indices = @transform_0, window_bounds = array<i64: 8, 32>}, {pipeline_mode = #tpu.pipeline_mode<synchronous>, transform_indices = @transform_1, window_bounds = array<i64: 32, 64>}, {pipeline_mode = #tpu.pipeline_mode<synchronous>, transform_indices = @transform_2, window_bounds = array<i64: 1, 64>}, {pipeline_mode = #tpu.pipeline_mode<synchronous>, transform_indices = @transform_3, window_bounds = array<i64: 64, 128>}, {pipeline_mode = #tpu.pipeline_mode<synchronous>, transform_indices = @transform_4, window_bounds = array<i64: 1, 16>}, {transform_indices = @transform_5, window_bounds = array<i64: 8, 16>}]} {
    %c0 = arith.constant 0 : index
    %c0_0 = arith.constant 0 : index
    %0 = vector.load %arg1[%c0, %c0_0] : memref<8x32xf32, #tpu.memory_space<vmem>>, vector<8x32xf32>
    %1 = arith.truncf %0 : vector<8x32xf32> to vector<8x32xbf16>
    %c0_1 = arith.constant 0 : index
    %c0_2 = arith.constant 0 : index
    %2 = vector.load %arg2[%c0_1, %c0_2] : memref<32x64xbf16, #tpu.memory_space<vmem>>, vector<32x64xbf16>
    %cst = arith.constant dense<0.000000e+00> : vector<8x64xf32>
    %3 = tpu.matmul %1, %2, %cst {dimension_numbers = #tpu.dot_dimension_numbers<[1], [0], [0], [1], [0, 0, 1, 1], [], []>} : vector<8x32xbf16>, vector<32x64xbf16>, vector<8x64xf32> -> vector<8x64xf32>
    %c0_3 = arith.constant 0 : index
    %c0_4 = arith.constant 0 : index
    %4 = vector.load %arg3[%c0_3, %c0_4] : memref<1x64xf32, #tpu.memory_space<vmem>>, vector<1x64xf32>
    %5 = vector.broadcast %4 : vector<1x64xf32> to vector<8x64xf32>
    %6 = arith.addf %3, %5 : vector<8x64xf32>
    %cst_5 = arith.constant 0.000000e+00 : f32
    %7 = vector.broadcast %cst_5 : f32 to vector<8x64xf32>
    %8 = arith.maximumf %6, %7 : vector<8x64xf32>
    %9 = arith.truncf %8 : vector<8x64xf32> to vector<8x64xbf16>
    %c0_6 = arith.constant 0 : index
    %c0_7 = arith.constant 0 : index
    %10 = vector.load %arg4[%c0_6, %c0_7] : memref<64x128xbf16, #tpu.memory_space<vmem>>, vector<64x128xbf16>
    %cst_8 = arith.constant dense<0.000000e+00> : vector<8x128xf32>
    %11 = tpu.matmul %9, %10, %cst_8 {dimension_numbers = #tpu.dot_dimension_numbers<[1], [0], [0], [1], [0, 0, 1, 1], [], []>} : vector<8x64xbf16>, vector<64x128xbf16>, vector<8x128xf32> -> vector<8x128xf32>
    %12 = vector.extract_strided_slice %11 {offsets = [0, 0], sizes = [8, 16], strides = [1, 1]} : vector<8x128xf32> to vector<8x16xf32>
    %c0_9 = arith.constant 0 : index
    %c0_10 = arith.constant 0 : index
    %13 = vector.load %arg5[%c0_9, %c0_10] : memref<1x16xf32, #tpu.memory_space<vmem>>, vector<1x16xf32>
    %14 = vector.broadcast %13 : vector<1x16xf32> to vector<8x16xf32>
    %15 = arith.addf %12, %14 : vector<8x16xf32>
    %c0_11 = arith.constant 0 : index
    %c0_12 = arith.constant 0 : index
    %16 = vector.load %arg6[%c0_11, %c0_12] : memref<8x16xf32, #tpu.memory_space<vmem>>, vector<8x16xf32>
    tpu.vector_store %arg6[%c0_11, %c0_12], %15 {strides = array<i32>} : memref<8x16xf32, #tpu.memory_space<vmem>>, vector<8x16xf32>,
    return
  }
  func.func @transform_0(%arg0: i32) -> (i32, i32) {
    %c0_i32 = arith.constant 0 : i32
    %c0_i32_0 = arith.constant 0 : i32
    return %arg0, %c0_i32 : i32, i32
  }
  func.func @transform_1(%arg0: i32) -> (i32, i32) {
    %c0_i32 = arith.constant 0 : i32
    %c0_i32_0 = arith.constant 0 : i32
    %c0_i32_1 = arith.constant 0 : i32
    return %c0_i32, %c0_i32_0 : i32, i32
  }
  func.func @transform_2(%arg0: i32) -> (i32, i32) {
    %c0_i32 = arith.constant 0 : i32
    %c0_i32_0 = arith.constant 0 : i32
    %c0_i32_1 = arith.constant 0 : i32
    return %c0_i32, %c0_i32_0 : i32, i32
  }
  func.func @transform_3(%arg0: i32) -> (i32, i32) {
    %c0_i32 = arith.constant 0 : i32
    %c0_i32_0 = arith.constant 0 : i32
    %c0_i32_1 = arith.constant 0 : i32
    return %c0_i32, %c0_i32_0 : i32, i32
  }
  func.func @transform_4(%arg0: i32) -> (i32, i32) {
    %c0_i32 = arith.constant 0 : i32
    %c0_i32_0 = arith.constant 0 : i32
    %c0_i32_1 = arith.constant 0 : i32
    return %c0_i32, %c0_i32_0 : i32, i32
  }
  func.func @transform_5(%arg0: i32) -> (i32, i32) {
    %c0_i32 = arith.constant 0 : i32
    %c0_i32_0 = arith.constant 0 : i32
    return %arg0, %c0_i32 : i32, i32
  }
}

</mosaic_0001>

<bundles_post_ra>
// kernel: simplenet_forward.1
= control target key start
LH: loop header
LB: loop body
LE: loop exit
PB: predicated region body
PF: predicated region fallthrough
CT: control target
= control target key end

     0   :  { %10 = vsyncpa [#allocation3], 0  ;;  %s421_s0 = inlined_call_operand.hbm [shape: f32[8,32], index: 0, kind: input, shape index: {}]   ;;  %s422_s1 = inlined_call_operand.hbm [shape: bf16[32,64], index: 1, kind: input, shape index: {}]   ;;  %s423_s2 = inlined_call_operand.hbm [shape: f32[1,64], index: 2, kind: input, shape index: {}]   ;;  %s424_s3 = inlined_call_operand.hbm [shape: bf16[64,128], index: 3, kind: input, shape index: {}]   ;;  %s425_s4 = inlined_call_operand.vmem [shape: f32[1,16], index: 4, kind: input, shape index: {}]   ;;  %s426_s5 = inlined_call_operand.hbm [shape: f32[8,16], index: 5, kind: output, shape index: {}]  }
   0x1   :  { %11 = vsyncpa [#allocation6], 0 }
   0x2   :  { %12 = vsyncpa [#allocation9], 0  ;;  %s29_s20 = sshll.u32 %s422_s1, 4  ;;  %s30_s20 = int_to_ptr.hbm [resolvable:$true] %s29_s20 }
   0x3   :  { %13 = vsyncpa [#allocation4], 0  ;;  %s366_s21 = smov [#allocation5]   ;;  %s19_s25 = sshll.u32 %s421_s0, 4  ;;  %s20_s25 = int_to_ptr.hbm [resolvable:$true] %s19_s25 }
   0x4   :  { %s31_s22 = sshll.u32 %s366_s21, 4  ;;  %s367_s26 = smov 64   ;;  %s32_s22 = int_to_ptr.vmem [resolvable:$true] %s31_s22 }
   0x5   :  { %s368_s27 = smov 4   ;;  %s369_s28 = smov [#allocation2]  }
   0x6   :  { %37 = dma.hbm_to_vmem [thread:$0]  %s30_s20, 256, %s32_s22, [#allocation6], %s367_s26, %s367_s26, %s368_s27  }
   0x7   :  { %s21_s29 = sshll.u32 %s369_s28, 4  ;;  %s43_s7 = sshll.u32 %s423_s2, 4  ;;  %s22_s29 = int_to_ptr.vmem [resolvable:$true] %s21_s29  ;;  %s44_s7 = int_to_ptr.hbm [resolvable:$true] %s43_s7 }
   0x8   :  { %24 = dma.hbm_to_vmem [thread:$0]  %s20_s25, 128, %s22_s29, [#allocation3]  }
   0x9   :  { %s53_s9 = sshll.u32 %s424_s3, 4  ;;  %s370_s10 = smov [#allocation7]   ;;  %s54_s9 = int_to_ptr.hbm [resolvable:$true] %s53_s9 }
   0xa   :  { %s45_s11 = sshll.u32 %s370_s10, 4  ;;  %s371_s0 = smov [#allocation8]   ;;  %s46_s11 = int_to_ptr.vmem [resolvable:$true] %s45_s11 }
   0xb   :  { %48 = dma.hbm_to_vmem [thread:$0]  %s44_s7, 16, %s46_s11, [#allocation6]  }
   0xc   :  { %s55_s12 = sshll.u32 %s371_s0, 4  ;;  %s56_s12 = int_to_ptr.vmem [resolvable:$true] %s55_s12 }
   0xd   :  { %61 = dma.hbm_to_vmem [thread:$0]  %s54_s9, 512, %s56_s12, [#allocation9], %s367_s26, %s367_s26, %s368_s27  }
   0xe   :  { %358 = dma.done.wait [#allocation3], 128  }
   0xf   :  { %359 = vsyncadd [#allocation3], 4294967168 }
  0x10   :  { %360 = dma.done.wait [#allocation6], 272  }
  0x11   :  { %361 = vsyncadd [#allocation6], 4294967024 }
  0x12   :  { %362 = dma.done.wait [#allocation9], 512  }
  0x13   :  { %363 = vsyncadd [#allocation9], 4294966784  ;;  %v224_v0 = vld [vmem:[#allocation5 + $0x8] sm:$0xff]  ;;  %v223_v2 = vld [vmem:[#allocation5] sm:$0xff]  ;;  %vm103_vm0 = vcmask 261120   ;;  %vm154_vm1 = vcmask 523264  }
  0x14   :  { %v228_v1 = vld [vmem:[#allocation8 + $0x18] sm:$0xff]  ;;  %113 = vmatpush.bf16.msra.mxu0 %v224_v0  ;;  %v81_v3 = vld [vmem:[#allocation2] sm:$0xff]  ;;  %v227_v4 = vld [vmem:[#allocation8 + $0x10] sm:$0xff]  ;;  %s372_s13 = smov [#allocation10]   ;;  %s185_s17 = sshll.u32 %s426_s5, 4  ;;  %vm176_vm2 = vcmask 130048   ;;  %s186_s17 = int_to_ptr.hbm [resolvable:$true] %s185_s17 }
  0x15   :  { %162 = vmatpush.bf16.msra.mxu1 %v228_v1  ;;  %v82_v5 = vpack.c.bf16 %v81_v3, %v81_v3  ;;  %v226_v6 = vld [vmem:[#allocation8 + $0x8] sm:$0xff]  ;;  %v225_v7 = vld [vmem:[#allocation8] sm:$0xff]  ;;  %v236_v8 = vld [vmem:[#allocation7] ss:$0 sm:$0xff]  ;;  %s183_s14 = sshll.u32 %s372_s13, 4  ;;  %s184_s14 = int_to_ptr.vmem [resolvable:$true] %s183_s14 }
  0x16   :  { %v237_v14 = vld [vmem:[%s425_s4] ss:$0 sm:$0xff] }
  0x18   :  { %114 = vmatpush.bf16.msra.mxu0 %v223_v2 }
  0x19   :  { %163 = vmatpush.bf16.msra.mxu1 %v227_v4 }
  0x1b   :  { %205 = vmatmul.msk.bf16.vlgmr.msra.gmra.mxu0 %vm103_vm0, %v82_v5 }
  0x1d   :  { %164 = vmatpush.bf16.msra.mxu1 %v226_v6 }
  0x21   :  { %165 = vmatpush.bf16.msra.mxu1 %v225_v7 }
  0x98   :  { %v116_v9 = vpop.f32.mrf.mxu0 }
  0x99   :  { %v117_v10 = vadd.f32 %v236_v8, %v116_v9 }
  0x9b   :  { %v120_v11 = vmax.f32 %v117_v10, 0.0 }
  0x9d   :  { %v121_v12 = vpack.c.bf16 %v120_v11, %v120_v11 }
  0x9f   :  { %222 = vmatmul.msk.bf16.vlgmr.msra.gmra.mxu1 %vm154_vm1, %v121_v12 }
  0xa0   :  { %v118_v13 = vpop.f32.mrf.mxu0 }
 0x11c   :  { %v167_v15 = vpop.f32.mrf.mxu1 }
 0x11d   :  { %v175_v16 = vadd.f32 %v237_v14, %v167_v15 }
 0x11f   :  { %177 = vst.msk [vmem:[#allocation10] sm:$0xff] %vm176_vm2, %v175_v16 }
 0x120   :  { %188 = dma.vmem_to_hbm [thread:$0]  %s184_s14, 128, %s186_s17, [#allocation4]  }
 0x124   :  { %v169_v17 = vpop.f32.mrf.mxu1 }
 0x125   :  { %364 = dma.done.wait [#allocation4], 128  }
 0x126   :  { %365 = vsyncadd [#allocation4], 4294967168 }
 0x127   :  { %193 = vsyncpa [#allocation3], 1 }
 0x128   :  { %194 = vsyncpa [#allocation6], 1 }
 0x129   :  { %195 = vsyncpa [#allocation9], 1 }
 0x12a   :  { %196 = vsyncpa [#allocation4], 1 }

</bundles_post_ra>
